<compile_context>
chip_gen: v6e
topology: v6e:2x2x1
jax: 0.10.0
libtpu: 0.0.40
codegen_flags: <defaults>
</compile_context>

<pallas_src>
import functools

import jax
import jax.numpy as jnp
from jax.experimental import pallas as pl
from jax.experimental.pallas import tpu as pltpu


def _bbasic_conv2d_kernel(x_ref, w_ref, scale_ref, shift_ref, o_ref,
                          *, KH, KW, Wp, Ho, Wo):
    """One grid step = one image of the batch.

    x_ref:     (1, Cin, Lin)       bf16  flattened zero-padded image (+ tail row)
    w_ref:     (KH*KW, Cout, Cin)  bf16  conv weight, tap-major (t = kh*KW + kw)
    scale_ref: (Cout, 1)           f32   folded BN scale = gamma / sqrt(var + eps)
    shift_ref: (Cout, 1)           f32   folded BN shift = beta - mean * scale
    o_ref:     (1, Cout, Ho*Wo)    f32   NCHW output with flattened spatial (lanes)
    """
    Lacc = Ho * Wp  # accumulate over Ho full padded rows (extract valid cols later)

    # Conv as KH*KW shifted matmuls.  Each shifted operand is a pure lane-offset
    # slice of the flat padded image -- no strided window slice, no reshape.
    acc = None
    for kh in range(KH):
        for kw in range(KW):
            t = kh * KW + kw
            s = kh * Wp + kw                       # lane offset of this tap
            z = x_ref[0, :, s:s + Lacc]            # (Cin, Lacc) bf16
            term = jnp.dot(w_ref[t], z, preferred_element_type=jnp.float32)
            acc = term if acc is None else acc + term   # (Cout, Lacc) f32

    # Fused BatchNorm (eval mode, folded) + ReLU.
    y = jnp.maximum(acc * scale_ref[...] + shift_ref[...], 0.0)

    if Wp == Wo:
        # No W padding: the accumulation frame is exactly the output frame.
        o_ref[0] = y.astype(o_ref.dtype)
    else:
        # Select the valid window once: drop the (Wp - Wo) padded columns of each
        # of the Ho rows (cheap lane-slice copies; HBM writeback stays one dense
        # 256-lane block per grid step).
        for h in range(Ho):
            o_ref[0, :, h * Wo:(h + 1) * Wo] = (
                y[:, h * Wp:h * Wp + Wo].astype(o_ref.dtype))


def bbasic_conv2d(x_nchw, weight_oihw, gamma, beta, running_mean, running_var,
                  *, stride=1, padding=0, dilation=1, groups=1, eps=1e-5):
    """Forward pass of BBasicConv2d. Input/output are NCHW like PyTorch."""
    assert stride == 1 and dilation == 1 and groups == 1, \
        "kernel implements the module defaults (stride=1, dilation=1, groups=1)"

    N, Cin, H, W = x_nchw.shape
    Cout, Cin_w, KH, KW = weight_oihw.shape
    assert Cin == Cin_w
    Hp, Wp = H + 2 * padding, W + 2 * padding
    Ho, Wo = Hp - KH + 1, Wp - KW + 1
    assert Ho > 0 and Wo > 0

    # --- glue: single pad (no transposes), flatten spatial onto the lane axis,
    #     cast MXU operands to bf16.  One extra zero row at the bottom keeps
    #     every tap's flat slice (offset up to (KH-1)*Wp + KW-1) in bounds.
    x_p = jnp.pad(x_nchw.astype(jnp.bfloat16),
                  ((0, 0), (0, 0), (padding, padding + 1), (padding, padding)))
    Lin = (Hp + 1) * Wp
    x_flat = x_p.reshape(N, Cin, Lin)

    # Weight OIHW -> (tap, Cout, Cin), tap-major = kh*KW + kw (matches the kernel).
    w_taps = jnp.transpose(weight_oihw, (2, 3, 0, 1)).reshape(KH * KW, Cout, Cin)
    w_taps = w_taps.astype(jnp.bfloat16)

    # Fold eval-mode BatchNorm into a per-channel scale/shift (f32).
    inv_std = 1.0 / jnp.sqrt(running_var.astype(jnp.float32) + eps)
    scale = (gamma.astype(jnp.float32) * inv_std).reshape(Cout, 1)
    shift = (beta.astype(jnp.float32)
             - running_mean.astype(jnp.float32) * gamma.astype(jnp.float32) * inv_std
             ).reshape(Cout, 1)

    kernel = functools.partial(_bbasic_conv2d_kernel,
                               KH=KH, KW=KW, Wp=Wp, Ho=Ho, Wo=Wo)

    out_flat = pl.pallas_call(
        kernel,
        out_shape=jax.ShapeDtypeStruct((N, Cout, Ho * Wo), jnp.float32),
        grid_spec=pltpu.PrefetchScalarGridSpec(
            num_scalar_prefetch=0,
            grid=(N,),
            in_specs=[
                pl.BlockSpec((1, Cin, Lin), lambda n: (n, 0, 0)),
                pl.BlockSpec((KH * KW, Cout, Cin), lambda n: (0, 0, 0)),
                pl.BlockSpec((Cout, 1), lambda n: (0, 0)),
                pl.BlockSpec((Cout, 1), lambda n: (0, 0)),
            ],
            out_specs=pl.BlockSpec((1, Cout, Ho * Wo), lambda n: (n, 0, 0)),
        ),
        compiler_params=pltpu.CompilerParams(
            dimension_semantics=("parallel",),      # shards batch across v7x TCs
            vmem_limit_bytes=32 * 1024 * 1024,      # explicit; safe on v5e/v6e/v7x
        ),
    )(x_flat, w_taps, scale, shift)

    # Data is already in NCHW order; this reshape is free (no transpose/copy).
    return out_flat.reshape(N, Cout, Ho, Wo)


def _reference(x_nchw, weight_oihw, gamma, beta, running_mean, running_var,
               padding, eps=1e-5):
    """Pure-JAX reference (lax conv + eval-mode BN + ReLU), with the same bf16
    rounding of x / w as the kernel so the comparison isolates the kernel."""
    xb = x_nchw.astype(jnp.bfloat16).astype(jnp.float32)
    wb = weight_oihw.astype(jnp.bfloat16).astype(jnp.float32)
    y = jax.lax.conv_general_dilated(
        xb, wb, window_strides=(1, 1),
        padding=((padding, padding), (padding, padding)),
        dimension_numbers=("NCHW", "OIHW", "NCHW"))
    inv_std = 1.0 / jnp.sqrt(running_var + eps)
    scale = (gamma * inv_std)[None, :, None, None]
    shift = (beta - running_mean * gamma * inv_std)[None, :, None, None]
    return jnp.maximum(y * scale + shift, 0.0)


if __name__ == "__main__":
    # Small shapes consistent with the module: batch=2, in_planes=4, out_planes=8,
    # spatial 16x16, kernel_size=3, padding=1 (stride=1, groups=1, bias=False).
    N, Cin, Cout, H, W, K, PAD = 2, 4, 8, 16, 16, 3, 1

    key = jax.random.PRNGKey(0)
    kx, kw_, kg, kb, km, kv = jax.random.split(key, 6)

    x = jax.random.normal(kx, (N, Cin, H, W), dtype=jnp.float32)
    weight = jax.random.normal(kw_, (Cout, Cin, K, K), dtype=jnp.float32) * 0.1
    gamma = 1.0 + 0.1 * jax.random.normal(kg, (Cout,), dtype=jnp.float32)
    beta = 0.1 * jax.random.normal(kb, (Cout,), dtype=jnp.float32)
    running_mean = 0.1 * jax.random.normal(km, (Cout,), dtype=jnp.float32)
    running_var = jnp.abs(jax.random.normal(kv, (Cout,), dtype=jnp.float32)) + 0.5

    out = bbasic_conv2d(x, weight, gamma, beta, running_mean, running_var,
                        stride=1, padding=PAD)
    out = jax.block_until_ready(out)

    ref = _reference(x, weight, gamma, beta, running_mean, running_var, PAD)
    assert out.shape == (N, Cout, H, W), out.shape
    max_err = jnp.max(jnp.abs(out - ref))
    assert jnp.allclose(out, ref, atol=2e-3, rtol=2e-3), f"max abs err {max_err}"

    print("KERNEL_OK")
</pallas_src>

<mosaic_0001>
module attributes {stable_mosaic.version = 11 : i64} {
  func.func @_bbasic_conv2d_kernel(%arg0: i32, %arg1: memref<1x4x342xbf16, #tpu.memory_space<vmem>>, %arg2: memref<9x8x4xbf16, #tpu.memory_space<vmem>>, %arg3: memref<8x1xf32, #tpu.memory_space<vmem>>, %arg4: memref<8x1xf32, #tpu.memory_space<vmem>>, %arg5: memref<1x8x256xf32, #tpu.memory_space<vmem>>) attributes {dimension_semantics = [#tpu.dimension_semantics<parallel>], iteration_bounds = array<i64: 2>, scalar_prefetch = 0 : i64, scratch_operands = 0 : i64, tpu.core_type = #tpu.core_type<tc>, window_params = [{transform_indices = @transform_0, window_bounds = array<i64: 1, 4, 342>}, {pipeline_mode = #tpu.pipeline_mode<synchronous>, transform_indices = @transform_1, window_bounds = array<i64: 9, 8, 4>}, {pipeline_mode = #tpu.pipeline_mode<synchronous>, transform_indices = @transform_2, window_bounds = array<i64: 8, 1>}, {pipeline_mode = #tpu.pipeline_mode<synchronous>, transform_indices = @transform_3, window_bounds = array<i64: 8, 1>}, {transform_indices = @transform_4, window_bounds = array<i64: 1, 8, 256>}]} {
    %c0 = arith.constant 0 : index
    %c0_0 = arith.constant 0 : index
    %c0_1 = arith.constant 0 : index
    %0 = vector.load %arg1[%c0, %c0_0, %c0_1] : memref<1x4x342xbf16, #tpu.memory_space<vmem>>, vector<1x4x288xbf16>
    %1 = vector.shape_cast %0 : vector<1x4x288xbf16> to vector<4x288xbf16>
    %c0_2 = arith.constant 0 : index
    %c0_3 = arith.constant 0 : index
    %c0_4 = arith.constant 0 : index
    %2 = vector.load %arg2[%c0_2, %c0_3, %c0_4] : memref<9x8x4xbf16, #tpu.memory_space<vmem>>, vector<1x8x4xbf16>
    %3 = vector.shape_cast %2 : vector<1x8x4xbf16> to vector<8x4xbf16>
    %cst = arith.constant dense<0.000000e+00> : vector<8x288xf32>
    %4 = tpu.matmul %3, %1, %cst {dimension_numbers = #tpu.dot_dimension_numbers<[1], [0], [0], [1], [0, 0, 1, 1], [], []>} : vector<8x4xbf16>, vector<4x288xbf16>, vector<8x288xf32> -> vector<8x288xf32>
    %c0_5 = arith.constant 0 : index
    %c0_6 = arith.constant 0 : index
    %c1 = arith.constant 1 : index
    %5 = vector.load %arg1[%c0_5, %c0_6, %c1] : memref<1x4x342xbf16, #tpu.memory_space<vmem>>, vector<1x4x288xbf16>
    %6 = vector.shape_cast %5 : vector<1x4x288xbf16> to vector<4x288xbf16>
    %c1_7 = arith.constant 1 : index
    %c0_8 = arith.constant 0 : index
    %c0_9 = arith.constant 0 : index
    %7 = vector.load %arg2[%c1_7, %c0_8, %c0_9] : memref<9x8x4xbf16, #tpu.memory_space<vmem>>, vector<1x8x4xbf16>
    %8 = vector.shape_cast %7 : vector<1x8x4xbf16> to vector<8x4xbf16>
    %cst_10 = arith.constant dense<0.000000e+00> : vector<8x288xf32>
    %9 = tpu.matmul %8, %6, %cst_10 {dimension_numbers = #tpu.dot_dimension_numbers<[1], [0], [0], [1], [0, 0, 1, 1], [], []>} : vector<8x4xbf16>, vector<4x288xbf16>, vector<8x288xf32> -> vector<8x288xf32>
    %10 = arith.addf %4, %9 : vector<8x288xf32>
    %c0_11 = arith.constant 0 : index
    %c0_12 = arith.constant 0 : index
    %c2 = arith.constant 2 : index
    %11 = vector.load %arg1[%c0_11, %c0_12, %c2] : memref<1x4x342xbf16, #tpu.memory_space<vmem>>, vector<1x4x288xbf16>
    %12 = vector.shape_cast %11 : vector<1x4x288xbf16> to vector<4x288xbf16>
    %c2_13 = arith.constant 2 : index
    %c0_14 = arith.constant 0 : index
    %c0_15 = arith.constant 0 : index
    %13 = vector.load %arg2[%c2_13, %c0_14, %c0_15] : memref<9x8x4xbf16, #tpu.memory_space<vmem>>, vector<1x8x4xbf16>
    %14 = vector.shape_cast %13 : vector<1x8x4xbf16> to vector<8x4xbf16>
    %cst_16 = arith.constant dense<0.000000e+00> : vector<8x288xf32>
    %15 = tpu.matmul %14, %12, %cst_16 {dimension_numbers = #tpu.dot_dimension_numbers<[1], [0], [0], [1], [0, 0, 1, 1], [], []>} : vector<8x4xbf16>, vector<4x288xbf16>, vector<8x288xf32> -> vector<8x288xf32>
    %16 = arith.addf %10, %15 : vector<8x288xf32>
    %c0_17 = arith.constant 0 : index
    %c0_18 = arith.constant 0 : index
    %c18 = arith.constant 18 : index
    %17 = vector.load %arg1[%c0_17, %c0_18, %c18] : memref<1x4x342xbf16, #tpu.memory_space<vmem>>, vector<1x4x288xbf16>
    %18 = vector.shape_cast %17 : vector<1x4x288xbf16> to vector<4x288xbf16>
    %c3 = arith.constant 3 : index
    %c0_19 = arith.constant 0 : index
    %c0_20 = arith.constant 0 : index
    %19 = vector.load %arg2[%c3, %c0_19, %c0_20] : memref<9x8x4xbf16, #tpu.memory_space<vmem>>, vector<1x8x4xbf16>
    %20 = vector.shape_cast %19 : vector<1x8x4xbf16> to vector<8x4xbf16>
    %cst_21 = arith.constant dense<0.000000e+00> : vector<8x288xf32>
    %21 = tpu.matmul %20, %18, %cst_21 {dimension_numbers = #tpu.dot_dimension_numbers<[1], [0], [0], [1], [0, 0, 1, 1], [], []>} : vector<8x4xbf16>, vector<4x288xbf16>, vector<8x288xf32> -> vector<8x288xf32>
    %22 = arith.addf %16, %21 : vector<8x288xf32>
    %c0_22 = arith.constant 0 : index
    %c0_23 = arith.constant 0 : index
    %c19 = arith.constant 19 : index
    %23 = vector.load %arg1[%c0_22, %c0_23, %c19] : memref<1x4x342xbf16, #tpu.memory_space<vmem>>, vector<1x4x288xbf16>
    %24 = vector.shape_cast %23 : vector<1x4x288xbf16> to vector<4x288xbf16>
    %c4 = arith.constant 4 : index
    %c0_24 = arith.constant 0 : index
    %c0_25 = arith.constant 0 : index
    %25 = vector.load %arg2[%c4, %c0_24, %c0_25] : memref<9x8x4xbf16, #tpu.memory_space<vmem>>, vector<1x8x4xbf16>
    %26 = vector.shape_cast %25 : vector<1x8x4xbf16> to vector<8x4xbf16>
    %cst_26 = arith.constant dense<0.000000e+00> : vector<8x288xf32>
    %27 = tpu.matmul %26, %24, %cst_26 {dimension_numbers = #tpu.dot_dimension_numbers<[1], [0], [0], [1], [0, 0, 1, 1], [], []>} : vector<8x4xbf16>, vector<4x288xbf16>, vector<8x288xf32> -> vector<8x288xf32>
    %28 = arith.addf %22, %27 : vector<8x288xf32>
    %c0_27 = arith.constant 0 : index
    %c0_28 = arith.constant 0 : index
    %c20 = arith.constant 20 : index
    %29 = vector.load %arg1[%c0_27, %c0_28, %c20] : memref<1x4x342xbf16, #tpu.memory_space<vmem>>, vector<1x4x288xbf16>
    %30 = vector.shape_cast %29 : vector<1x4x288xbf16> to vector<4x288xbf16>
    %c5 = arith.constant 5 : index
    %c0_29 = arith.constant 0 : index
    %c0_30 = arith.constant 0 : index
    %31 = vector.load %arg2[%c5, %c0_29, %c0_30] : memref<9x8x4xbf16, #tpu.memory_space<vmem>>, vector<1x8x4xbf16>
    %32 = vector.shape_cast %31 : vector<1x8x4xbf16> to vector<8x4xbf16>
    %cst_31 = arith.constant dense<0.000000e+00> : vector<8x288xf32>
    %33 = tpu.matmul %32, %30, %cst_31 {dimension_numbers = #tpu.dot_dimension_numbers<[1], [0], [0], [1], [0, 0, 1, 1], [], []>} : vector<8x4xbf16>, vector<4x288xbf16>, vector<8x288xf32> -> vector<8x288xf32>
    %34 = arith.addf %28, %33 : vector<8x288xf32>
    %c0_32 = arith.constant 0 : index
    %c0_33 = arith.constant 0 : index
    %c36 = arith.constant 36 : index
    %35 = vector.load %arg1[%c0_32, %c0_33, %c36] : memref<1x4x342xbf16, #tpu.memory_space<vmem>>, vector<1x4x288xbf16>
    %36 = vector.shape_cast %35 : vector<1x4x288xbf16> to vector<4x288xbf16>
    %c6 = arith.constant 6 : index
    %c0_34 = arith.constant 0 : index
    %c0_35 = arith.constant 0 : index
    %37 = vector.load %arg2[%c6, %c0_34, %c0_35] : memref<9x8x4xbf16, #tpu.memory_space<vmem>>, vector<1x8x4xbf16>
    %38 = vector.shape_cast %37 : vector<1x8x4xbf16> to vector<8x4xbf16>
    %cst_36 = arith.constant dense<0.000000e+00> : vector<8x288xf32>
    %39 = tpu.matmul %38, %36, %cst_36 {dimension_numbers = #tpu.dot_dimension_numbers<[1], [0], [0], [1], [0, 0, 1, 1], [], []>} : vector<8x4xbf16>, vector<4x288xbf16>, vector<8x288xf32> -> vector<8x288xf32>
    %40 = arith.addf %34, %39 : vector<8x288xf32>
    %c0_37 = arith.constant 0 : index
    %c0_38 = arith.constant 0 : index
    %c37 = arith.constant 37 : index
    %41 = vector.load %arg1[%c0_37, %c0_38, %c37] : memref<1x4x342xbf16, #tpu.memory_space<vmem>>, vector<1x4x288xbf16>
    %42 = vector.shape_cast %41 : vector<1x4x288xbf16> to vector<4x288xbf16>
    %c7 = arith.constant 7 : index
    %c0_39 = arith.constant 0 : index
    %c0_40 = arith.constant 0 : index
    %43 = vector.load %arg2[%c7, %c0_39, %c0_40] : memref<9x8x4xbf16, #tpu.memory_space<vmem>>, vector<1x8x4xbf16>
    %44 = vector.shape_cast %43 : vector<1x8x4xbf16> to vector<8x4xbf16>
    %cst_41 = arith.constant dense<0.000000e+00> : vector<8x288xf32>
    %45 = tpu.matmul %44, %42, %cst_41 {dimension_numbers = #tpu.dot_dimension_numbers<[1], [0], [0], [1], [0, 0, 1, 1], [], []>} : vector<8x4xbf16>, vector<4x288xbf16>, vector<8x288xf32> -> vector<8x288xf32>
    %46 = arith.addf %40, %45 : vector<8x288xf32>
    %c0_42 = arith.constant 0 : index
    %c0_43 = arith.constant 0 : index
    %c38 = arith.constant 38 : index
    %47 = vector.load %arg1[%c0_42, %c0_43, %c38] : memref<1x4x342xbf16, #tpu.memory_space<vmem>>, vector<1x4x288xbf16>
    %48 = vector.shape_cast %47 : vector<1x4x288xbf16> to vector<4x288xbf16>
    %c8 = arith.constant 8 : index
    %c0_44 = arith.constant 0 : index
    %c0_45 = arith.constant 0 : index
    %49 = vector.load %arg2[%c8, %c0_44, %c0_45] : memref<9x8x4xbf16, #tpu.memory_space<vmem>>, vector<1x8x4xbf16>
    %50 = vector.shape_cast %49 : vector<1x8x4xbf16> to vector<8x4xbf16>
    %cst_46 = arith.constant dense<0.000000e+00> : vector<8x288xf32>
    %51 = tpu.matmul %50, %48, %cst_46 {dimension_numbers = #tpu.dot_dimension_numbers<[1], [0], [0], [1], [0, 0, 1, 1], [], []>} : vector<8x4xbf16>, vector<4x288xbf16>, vector<8x288xf32> -> vector<8x288xf32>
    %52 = arith.addf %46, %51 : vector<8x288xf32>
    %c0_47 = arith.constant 0 : index
    %c0_48 = arith.constant 0 : index
    %53 = vector.load %arg3[%c0_47, %c0_48] : memref<8x1xf32, #tpu.memory_space<vmem>>, vector<8x1xf32>
    %54 = vector.broadcast %53 : vector<8x1xf32> to vector<8x288xf32>
    %55 = arith.mulf %52, %54 : vector<8x288xf32>
    %c0_49 = arith.constant 0 : index
    %c0_50 = arith.constant 0 : index
    %56 = vector.load %arg4[%c0_49, %c0_50] : memref<8x1xf32, #tpu.memory_space<vmem>>, vector<8x1xf32>
    %57 = vector.broadcast %56 : vector<8x1xf32> to vector<8x288xf32>
    %58 = arith.addf %55, %57 : vector<8x288xf32>
    %cst_51 = arith.constant 0.000000e+00 : f32
    %59 = vector.broadcast %cst_51 : f32 to vector<8x288xf32>
    %60 = arith.maximumf %58, %59 : vector<8x288xf32>
    %61 = vector.extract_strided_slice %60 {offsets = [0, 0], sizes = [8, 16], strides = [1, 1]} : vector<8x288xf32> to vector<8x16xf32>
    %c0_52 = arith.constant 0 : index
    %c0_53 = arith.constant 0 : index
    %c0_54 = arith.constant 0 : index
    %62 = vector.load %arg5[%c0_52, %c0_53, %c0_54] : memref<1x8x256xf32, #tpu.memory_space<vmem>>, vector<1x8x16xf32>
    %63 = vector.shape_cast %62 : vector<1x8x16xf32> to vector<8x16xf32>
    %64 = vector.shape_cast %61 : vector<8x16xf32> to vector<1x8x16xf32>
    tpu.vector_store %arg5[%c0_52, %c0_53, %c0_54], %64 {strides = array<i32>} : memref<1x8x256xf32, #tpu.memory_space<vmem>>, vector<1x8x16xf32>,
    %65 = vector.extract_strided_slice %60 {offsets = [0, 18], sizes = [8, 16], strides = [1, 1]} : vector<8x288xf32> to vector<8x16xf32>
    %c0_55 = arith.constant 0 : index
    %c0_56 = arith.constant 0 : index
    %c16 = arith.constant 16 : index
    %66 = vector.load %arg5[%c0_55, %c0_56, %c16] : memref<1x8x256xf32, #tpu.memory_space<vmem>>, vector<1x8x16xf32>
    %67 = vector.shape_cast %66 : vector<1x8x16xf32> to vector<8x16xf32>
    %68 = vector.shape_cast %65 : vector<8x16xf32> to vector<1x8x16xf32>
    tpu.vector_store %arg5[%c0_55, %c0_56, %c16], %68 {strides = array<i32>} : memref<1x8x256xf32, #tpu.memory_space<vmem>>, vector<1x8x16xf32>,
    %69 = vector.extract_strided_slice %60 {offsets = [0, 36], sizes = [8, 16], strides = [1, 1]} : vector<8x288xf32> to vector<8x16xf32>
    %c0_57 = arith.constant 0 : index
    %c0_58 = arith.constant 0 : index
    %c32 = arith.constant 32 : index
    %70 = vector.load %arg5[%c0_57, %c0_58, %c32] : memref<1x8x256xf32, #tpu.memory_space<vmem>>, vector<1x8x16xf32>
    %71 = vector.shape_cast %70 : vector<1x8x16xf32> to vector<8x16xf32>
    %72 = vector.shape_cast %69 : vector<8x16xf32> to vector<1x8x16xf32>
    tpu.vector_store %arg5[%c0_57, %c0_58, %c32], %72 {strides = array<i32>} : memref<1x8x256xf32, #tpu.memory_space<vmem>>, vector<1x8x16xf32>,
    %73 = vector.extract_strided_slice %60 {offsets = [0, 54], sizes = [8, 16], strides = [1, 1]} : vector<8x288xf32> to vector<8x16xf32>
    %c0_59 = arith.constant 0 : index
    %c0_60 = arith.constant 0 : index
    %c48 = arith.constant 48 : index
    %74 = vector.load %arg5[%c0_59, %c0_60, %c48] : memref<1x8x256xf32, #tpu.memory_space<vmem>>, vector<1x8x16xf32>
    %75 = vector.shape_cast %74 : vector<1x8x16xf32> to vector<8x16xf32>
    %76 = vector.shape_cast %73 : vector<8x16xf32> to vector<1x8x16xf32>
    tpu.vector_store %arg5[%c0_59, %c0_60, %c48], %76 {strides = array<i32>} : memref<1x8x256xf32, #tpu.memory_space<vmem>>, vector<1x8x16xf32>,
    %77 = vector.extract_strided_slice %60 {offsets = [0, 72], sizes = [8, 16], strides = [1, 1]} : vector<8x288xf32> to vector<8x16xf32>
    %c0_61 = arith.constant 0 : index
    %c0_62 = arith.constant 0 : index
    %c64 = arith.constant 64 : index
    %78 = vector.load %arg5[%c0_61, %c0_62, %c64] : memref<1x8x256xf32, #tpu.memory_space<vmem>>, vector<1x8x16xf32>
    %79 = vector.shape_cast %78 : vector<1x8x16xf32> to vector<8x16xf32>
    %80 = vector.shape_cast %77 : vector<8x16xf32> to vector<1x8x16xf32>
    tpu.vector_store %arg5[%c0_61, %c0_62, %c64], %80 {strides = array<i32>} : memref<1x8x256xf32, #tpu.memory_space<vmem>>, vector<1x8x16xf32>,
    %81 = vector.extract_strided_slice %60 {offsets = [0, 90], sizes = [8, 16], strides = [1, 1]} : vector<8x288xf32> to vector<8x16xf32>
    %c0_63 = arith.constant 0 : index
    %c0_64 = arith.constant 0 : index
    %c80 = arith.constant 80 : index
    %82 = vector.load %arg5[%c0_63, %c0_64, %c80] : memref<1x8x256xf32, #tpu.memory_space<vmem>>, vector<1x8x16xf32>
    %83 = vector.shape_cast %82 : vector<1x8x16xf32> to vector<8x16xf32>
    %84 = vector.shape_cast %81 : vector<8x16xf32> to vector<1x8x16xf32>
    tpu.vector_store %arg5[%c0_63, %c0_64, %c80], %84 {strides = array<i32>} : memref<1x8x256xf32, #tpu.memory_space<vmem>>, vector<1x8x16xf32>,
    %85 = vector.extract_strided_slice %60 {offsets = [0, 108], sizes = [8, 16], strides = [1, 1]} : vector<8x288xf32> to vector<8x16xf32>
    %c0_65 = arith.constant 0 : index
    %c0_66 = arith.constant 0 : index
    %c96 = arith.constant 96 : index
    %86 = vector.load %arg5[%c0_65, %c0_66, %c96] : memref<1x8x256xf32, #tpu.memory_space<vmem>>, vector<1x8x16xf32>
    %87 = vector.shape_cast %86 : vector<1x8x16xf32> to vector<8x16xf32>
    %88 = vector.shape_cast %85 : vector<8x16xf32> to vector<1x8x16xf32>
    tpu.vector_store %arg5[%c0_65, %c0_66, %c96], %88 {strides = array<i32>} : memref<1x8x256xf32, #tpu.memory_space<vmem>>, vector<1x8x16xf32>,
    %89 = vector.extract_strided_slice %60 {offsets = [0, 126], sizes = [8, 16], strides = [1, 1]} : vector<8x288xf32> to vector<8x16xf32>
    %c0_67 = arith.constant 0 : index
    %c0_68 = arith.constant 0 : index
    %c112 = arith.constant 112 : index
    %90 = vector.load %arg5[%c0_67, %c0_68, %c112] : memref<1x8x256xf32, #tpu.memory_space<vmem>>, vector<1x8x16xf32>
    %91 = vector.shape_cast %90 : vector<1x8x16xf32> to vector<8x16xf32>
    %92 = vector.shape_cast %89 : vector<8x16xf32> to vector<1x8x16xf32>
    tpu.vector_store %arg5[%c0_67, %c0_68, %c112], %92 {strides = array<i32>} : memref<1x8x256xf32, #tpu.memory_space<vmem>>, vector<1x8x16xf32>,
    %93 = vector.extract_strided_slice %60 {offsets = [0, 144], sizes = [8, 16], strides = [1, 1]} : vector<8x288xf32> to vector<8x16xf32>
    %c0_69 = arith.constant 0 : index
    %c0_70 = arith.constant 0 : index
    %c128 = arith.constant 128 : index
    %94 = vector.load %arg5[%c0_69, %c0_70, %c128] : memref<1x8x256xf32, #tpu.memory_space<vmem>>, vector<1x8x16xf32>
    %95 = vector.shape_cast %94 : vector<1x8x16xf32> to vector<8x16xf32>
    %96 = vector.shape_cast %93 : vector<8x16xf32> to vector<1x8x16xf32>
    tpu.vector_store %arg5[%c0_69, %c0_70, %c128], %96 {strides = array<i32>} : memref<1x8x256xf32, #tpu.memory_space<vmem>>, vector<1x8x16xf32>,
    %97 = vector.extract_strided_slice %60 {offsets = [0, 162], sizes = [8, 16], strides = [1, 1]} : vector<8x288xf32> to vector<8x16xf32>
    %c0_71 = arith.constant 0 : index
    %c0_72 = arith.constant 0 : index
    %c144 = arith.constant 144 : index
    %98 = vector.load %arg5[%c0_71, %c0_72, %c144] : memref<1x8x256xf32, #tpu.memory_space<vmem>>, vector<1x8x16xf32>
    %99 = vector.shape_cast %98 : vector<1x8x16xf32> to vector<8x16xf32>
    %100 = vector.shape_cast %97 : vector<8x16xf32> to vector<1x8x16xf32>
    tpu.vector_store %arg5[%c0_71, %c0_72, %c144], %100 {strides = array<i32>} : memref<1x8x256xf32, #tpu.memory_space<vmem>>, vector<1x8x16xf32>,
    %101 = vector.extract_strided_slice %60 {offsets = [0, 180], sizes = [8, 16], strides = [1, 1]} : vector<8x288xf32> to vector<8x16xf32>
    %c0_73 = arith.constant 0 : index
    %c0_74 = arith.constant 0 : index
    %c160 = arith.constant 160 : index
    %102 = vector.load %arg5[%c0_73, %c0_74, %c160] : memref<1x8x256xf32, #tpu.memory_space<vmem>>, vector<1x8x16xf32>
    %103 = vector.shape_cast %102 : vector<1x8x16xf32> to vector<8x16xf32>
    %104 = vector.shape_cast %101 : vector<8x16xf32> to vector<1x8x16xf32>
    tpu.vector_store %arg5[%c0_73, %c0_74, %c160], %104 {strides = array<i32>} : memref<1x8x256xf32, #tpu.memory_space<vmem>>, vector<1x8x16xf32>,
    %105 = vector.extract_strided_slice %60 {offsets = [0, 198], sizes = [8, 16], strides = [1, 1]} : vector<8x288xf32> to vector<8x16xf32>
    %c0_75 = arith.constant 0 : index
    %c0_76 = arith.constant 0 : index
    %c176 = arith.constant 176 : index
    %106 = vector.load %arg5[%c0_75, %c0_76, %c176] : memref<1x8x256xf32, #tpu.memory_space<vmem>>, vector<1x8x16xf32>
    %107 = vector.shape_cast %106 : vector<1x8x16xf32> to vector<8x16xf32>
    %108 = vector.shape_cast %105 : vector<8x16xf32> to vector<1x8x16xf32>
    tpu.vector_store %arg5[%c0_75, %c0_76, %c176], %108 {strides = array<i32>} : memref<1x8x256xf32, #tpu.memory_space<vmem>>, vector<1x8x16xf32>,
    %109 = vector.extract_strided_slice %60 {offsets = [0, 216], sizes = [8, 16], strides = [1, 1]} : vector<8x288xf32> to vector<8x16xf32>
    %c0_77 = arith.constant 0 : index
    %c0_78 = arith.constant 0 : index
    %c192 = arith.constant 192 : index
    %110 = vector.load %arg5[%c0_77, %c0_78, %c192] : memref<1x8x256xf32, #tpu.memory_space<vmem>>, vector<1x8x16xf32>
    %111 = vector.shape_cast %110 : vector<1x8x16xf32> to vector<8x16xf32>
    %112 = vector.shape_cast %109 : vector<8x16xf32> to vector<1x8x16xf32>
    tpu.vector_store %arg5[%c0_77, %c0_78, %c192], %112 {strides = array<i32>} : memref<1x8x256xf32, #tpu.memory_space<vmem>>, vector<1x8x16xf32>,
    %113 = vector.extract_strided_slice %60 {offsets = [0, 234], sizes = [8, 16], strides = [1, 1]} : vector<8x288xf32> to vector<8x16xf32>
    %c0_79 = arith.constant 0 : index
    %c0_80 = arith.constant 0 : index
    %c208 = arith.constant 208 : index
    %114 = vector.load %arg5[%c0_79, %c0_80, %c208] : memref<1x8x256xf32, #tpu.memory_space<vmem>>, vector<1x8x16xf32>
    %115 = vector.shape_cast %114 : vector<1x8x16xf32> to vector<8x16xf32>
    %116 = vector.shape_cast %113 : vector<8x16xf32> to vector<1x8x16xf32>
    tpu.vector_store %arg5[%c0_79, %c0_80, %c208], %116 {strides = array<i32>} : memref<1x8x256xf32, #tpu.memory_space<vmem>>, vector<1x8x16xf32>,
    %117 = vector.extract_strided_slice %60 {offsets = [0, 252], sizes = [8, 16], strides = [1, 1]} : vector<8x288xf32> to vector<8x16xf32>
    %c0_81 = arith.constant 0 : index
    %c0_82 = arith.constant 0 : index
    %c224 = arith.constant 224 : index
    %118 = vector.load %arg5[%c0_81, %c0_82, %c224] : memref<1x8x256xf32, #tpu.memory_space<vmem>>, vector<1x8x16xf32>
    %119 = vector.shape_cast %118 : vector<1x8x16xf32> to vector<8x16xf32>
    %120 = vector.shape_cast %117 : vector<8x16xf32> to vector<1x8x16xf32>
    tpu.vector_store %arg5[%c0_81, %c0_82, %c224], %120 {strides = array<i32>} : memref<1x8x256xf32, #tpu.memory_space<vmem>>, vector<1x8x16xf32>,
    %121 = vector.extract_strided_slice %60 {offsets = [0, 270], sizes = [8, 16], strides = [1, 1]} : vector<8x288xf32> to vector<8x16xf32>
    %c0_83 = arith.constant 0 : index
    %c0_84 = arith.constant 0 : index
    %c240 = arith.constant 240 : index
    %122 = vector.load %arg5[%c0_83, %c0_84, %c240] : memref<1x8x256xf32, #tpu.memory_space<vmem>>, vector<1x8x16xf32>
    %123 = vector.shape_cast %122 : vector<1x8x16xf32> to vector<8x16xf32>
    %124 = vector.shape_cast %121 : vector<8x16xf32> to vector<1x8x16xf32>
    tpu.vector_store %arg5[%c0_83, %c0_84, %c240], %124 {strides = array<i32>} : memref<1x8x256xf32, #tpu.memory_space<vmem>>, vector<1x8x16xf32>,
    return
  }
  func.func @transform_0(%arg0: i32) -> (i32, i32, i32) {
    %c0_i32 = arith.constant 0 : i32
    %c0_i32_0 = arith.constant 0 : i32
    %c0_i32_1 = arith.constant 0 : i32
    return %arg0, %c0_i32, %c0_i32_0 : i32, i32, i32
  }
  func.func @transform_1(%arg0: i32) -> (i32, i32, i32) {
    %c0_i32 = arith.constant 0 : i32
    %c0_i32_0 = arith.constant 0 : i32
    %c0_i32_1 = arith.constant 0 : i32
    %c0_i32_2 = arith.constant 0 : i32
    return %c0_i32, %c0_i32_0, %c0_i32_1 : i32, i32, i32
  }
  func.func @transform_2(%arg0: i32) -> (i32, i32) {
    %c0_i32 = arith.constant 0 : i32
    %c0_i32_0 = arith.constant 0 : i32
    %c0_i32_1 = arith.constant 0 : i32
    return %c0_i32, %c0_i32_0 : i32, i32
  }
  func.func @transform_3(%arg0: i32) -> (i32, i32) {
    %c0_i32 = arith.constant 0 : i32
    %c0_i32_0 = arith.constant 0 : i32
    %c0_i32_1 = arith.constant 0 : i32
    return %c0_i32, %c0_i32_0 : i32, i32
  }
  func.func @transform_4(%arg0: i32) -> (i32, i32, i32) {
    %c0_i32 = arith.constant 0 : i32
    %c0_i32_0 = arith.constant 0 : i32
    %c0_i32_1 = arith.constant 0 : i32
    return %arg0, %c0_i32, %c0_i32_0 : i32, i32, i32
  }
}

</mosaic_0001>

<bundles_post_ra>
// kernel: tpu_custom_call.1
= control target key start
LH: loop header
LB: loop body
LE: loop exit
PB: predicated region body
PF: predicated region fallthrough
CT: control target
= control target key end

     0   :  { %9 = vsyncpa [#allocation3], 0  ;;  %s2068_s0 = inlined_call_operand.vmem [shape: bf16[2,4,342], index: 0, kind: input, shape index: {}]   ;;  %s2069_s1 = inlined_call_operand.vmem [shape: bf16[9,8,4], index: 1, kind: input, shape index: {}]   ;;  %s2070_s2 = inlined_call_operand.vmem [shape: f32[8,1], index: 2, kind: input, shape index: {}]   ;;  %s2071_s3 = inlined_call_operand.vmem [shape: f32[8,1], index: 3, kind: input, shape index: {}]   ;;  %s2072_s4 = inlined_call_operand.hbm [shape: f32[2,8,256], index: 4, kind: output, shape index: {}]  }
   0x1   :  { %11 = vsyncpa [#allocation3 + $0x1], 0  ;;  %s1770_s15 = smov 0   ;;  %s1772_s16 = smov 0  }
   0x2   :  { %s1774_s17 = smov 0   ;;  %s1776_s18 = smov 0  }
   0x3 LB: > { %s1791_s19 = sadd.s32 4294967295, %s1718_s18   ;;  %s1465_s20 = sadd.s32 4294967294, %s1718_s18   ;;  %s1718_s18 = sphi %s1776_s18, %s2078_s18   ;;  %s1714_s17 = sphi %s1774_s17, %s2077_s17   ;;  %s1710_s16 = sphi %s1772_s16, %s2076_s16   ;;  %s1706_s15 = sphi %s1770_s15, %s2075_s15  }
   0x4   : > { %s1795_s21 = sadd.s32 1, %s1718_s18   ;;  %s113_s22 = sadd.s32 1, %s1714_s17 }
   0x5   : > { %s110_s23 = ssub.s32 %s1718_s18, %s1795_s21  ;;  %p123_p0 = scmp.ne.s32.totalorder %s1714_s17, %s1710_s16 }
   0x6   : > { %p111_p1 = scmp.eq.s32.totalorder %s110_s23, 0  ;;  %p124_p2 = scmp.eq.s32.totalorder %s1791_s19, 1 }
   0x7   : > { %p129_p3 = scmp.ne.s32.totalorder %s1710_s16, %s1706_s15  ;;  %p130_p4 = scmp.eq.s32.totalorder %s1465_s20, 1 }
   0x8   : > { %s1806_s24 = scalar_select %p111_p1, %s1714_s17, %s113_s22  }
   0x9   : > { %p1808_p5 = por %p124_p2, %p123_p0  ;;  %p1812_p6 = por %p130_p4, %p129_p3 }
   0xa   : > { %p1468_p7 = scmp.ge.s32.totalorder %s1718_s18, 1  ;;  %p165_p8 = scmp.lt.s32.totalorder %s1718_s18, 3 }
   0xc   : > { %p166_p9 = pnand %p1468_p7, %p165_p8 }
   0xd   : > { %p191_p10 = scmp.lt.s32.totalorder (!%p166_p9), %s1791_s19, 1  ;;  %s1724_s6 = smov (!%p166_p9), 127  }
   0xe   : > { %169 = sbr.rel (%p166_p9) target bundleno = 574 (0x23e), region = 36  ;;  %s1725_s7 = smov (!%p166_p9), 126  }
   0xf   : > { %s1726_s8 = smov (!%p166_p9), 110   ;;  %s1727_s9 = smov (!%p166_p9), 109  }
  0x10   : > { %s1728_s10 = smov (!%p166_p9), 108   ;;  %s1729_s11 = smov (!%p166_p9), 92  }
  0x11   : > { %s1730_s12 = smov (!%p166_p9), 91   ;;  %s1731_s13 = smov (!%p166_p9), 90  }
  0x12   : > { %s1735_s14 = smov (!%p166_p9), 112   ;;  %s1736_s20 = smov (!%p166_p9), 122  }
  0x13   : > { %v206_v0 = vlaneseq  ;;  %v1720_v1 = vmov 1983009808   ;;  %v1721_v3 = vmov 0.0   ;;  %s192_s27 = scalar_select %p191_p10, %s1791_s19, 1  ;;  %vm1722_vm0 = vmmov 0   ;;  %v1290_v48 = vld [vmem:[%s2070_s2] sm:$0xff] }
  0x14   : > { %v204_v2 = vunpack.c.l.s4 %v1720_v1  ;;  %1530 = vmatprep.subr.bf16.mxu1 %v1721_v3  ;;  %1532 = vmatprep.mubr.msk.bf16.mxu1 %vm1722_vm0, %v1721_v3  ;;  %v1723_v7 = vmov 0   ;;  %v1299_v49 = vld [vmem:[%s2071_s3] sm:$0xff]  ;;  %vm231_vm1 = vcmask 1041408   ;;  %vm224_vm2 = vcmask 1039360   ;;  %s1737_s22 = smov 120   ;;  %s1739_s23 = smov 106  }
  0x15   : > { %v207_v4 = vshrl.u32 %v206_v0, 7  ;;  %s1584_s28 = smul.u32 6, %s192_s27  ;;  %273 = vmatprep.mubr.bf16.mxu0 %v1723_v7  ;;  %1648 = vset.pattern.permute.xlu0 %v1723_v7  ;;  %v1471_v54 = vld [vmem:[%s2069_s1 + $0x4] sm:$0xf]  ;;  %vm227_vm3 = vcmask 31744   ;;  %vm441_vm4 = vcmask 1031168  }
  0x16   : > { %v205_v5 = vunpack.c.0.s8 %v204_v2  ;;  %1649 = vset.pattern.permute.xlu1 %v1723_v7  ;;  %v198_v0 = vld [vmem:[%s2069_s1] sm:$0xf]  ;;  %vm566_vm5 = vcmask 900096   ;;  %vm691_vm6 = vcmask 891904   ;;  %vm816_vm7 = vcmask 883712   ;;  %s1740_s27 = smov 116  }
  0x17   : > { %s1830_s5 = scalar_lea.vmem %s2068_s0, %s1584_s28  ;;  %vm941_vm8 = vcmask 752640   ;;  %vm1066_vm9 = vcmask 744448   ;;  %vm1191_vm10 = vcmask 736256   ;;  %vm1311_vm11 = vcmask 130048   ;;  %s1741_s28 = smov 104  }
  0x18   : > { %v1823_v6 = vsub.s32 %v205_v5, %v207_v4  ;;  %v197_v8 = vld [vmem:[%s1830_s5] sm:$0x3f]  ;;  %s1742_s29 = smov 102   ;;  %vm1317_vm12 = vcmask 261248   ;;  %vm1322_vm13 = vcmask 392448   ;;  %vm1327_vm14 = vcmask 523648  }
  0x19   : > { %v415_v9 = vld [vmem:[%s1830_s5] sm:$0x3f]  ;;  %v202_v11 = vcombine.high %v197_v8, %v197_v8  ;;  %vm1332_vm15 = vcmask 654848  }
  0x1a   : > { %v1836_v10 = vrot.slane %v197_v8, %v1823_v6  ;;  %v426_v14 = vrot.slane %v415_v9, %v1823_v6  ;;  %v419_v15 = vcombine.high %v415_v9, %v415_v9  ;;  %v540_v16 = vld [vmem:[%s1830_s5] sm:$0x3f] }
  0x1b   : > { %v1840_v12 = vrot.slane %v202_v11, %v1823_v6  ;;  %v551_v19 = vrot.slane %v540_v16, %v1823_v6  ;;  %v544_v20 = vcombine.high %v540_v16, %v540_v16  ;;  %v665_v21 = vld [vmem:[%s1830_s5] sm:$0x3f]  ;;  %v1478_v11 = vld [vmem:[%s2069_s1 + $0x8] sm:$0xf] }
  0x1c   : > { %218 = vrot.lane.b32.xlu0 %v1836_v10, %s1724_s6  ;;  %v1844_v13 = vcombine.high %v1836_v10, %v1836_v10  ;;  %v434_v17 = vcombine.high %v426_v14, %v426_v14  ;;  %v433_v18 = vrot.slane %v419_v15, %v1823_v6  ;;  %v676_v24 = vrot.slane %v665_v21, %v1823_v6  ;;  %v790_v26 = vld [vmem:[%s1830_s5] sm:$0x3f] }
  0x1d   : > { %222 = vrot.lane.b32.xlu1 %v1840_v12, %s1724_s6  ;;  %v559_v22 = vcombine.high %v551_v19, %v551_v19  ;;  %v558_v23 = vrot.slane %v544_v20, %v1823_v6  ;;  %v669_v25 = vcombine.high %v665_v21, %v665_v21  ;;  %v801_v29 = vrot.slane %v790_v26, %v1823_v6  ;;  %v915_v31 = vld [vmem:[%s1830_s5] sm:$0x3f]  ;;  %v1482_v20 = vld [vmem:[%s2069_s1 + $0xc] sm:$0xf] }
  0x1e   : > { %v684_v27 = vcombine.high %v676_v24, %v676_v24  ;;  %v794_v30 = vcombine.high %v790_v26, %v790_v26  ;;  %v926_v34 = vrot.slane %v915_v31, %v1823_v6  ;;  %v919_v35 = vcombine.high %v915_v31, %v915_v31  ;;  %v1040_v36 = vld [vmem:[%s1830_s5] sm:$0x3f] }
  0x1f   : > { %v683_v28 = vrot.slane %v669_v25, %v1823_v6  ;;  %v809_v32 = vcombine.high %v801_v29, %v801_v29  ;;  %v1051_v39 = vrot.slane %v1040_v36, %v1823_v6  ;;  %v1044_v40 = vcombine.high %v1040_v36, %v1040_v36  ;;  %v1165_v41 = vld [vmem:[%s1830_s5] sm:$0x3f]  ;;  %v1490_v36 = vld [vmem:[%s2069_s1 + $0x14] sm:$0xf]  ;;  %s188_s5 = sand.u32 1, %s1710_s16  }
  0x20   : > { %220 = vrot.lane.b32.xlu0 %v1844_v13, %s1724_s6  ;;  %v808_v33 = vrot.slane %v794_v30, %v1823_v6  ;;  %v934_v37 = vcombine.high %v926_v34, %v926_v34  ;;  %v933_v38 = vrot.slane %v919_v35, %v1823_v6  ;;  %v1176_v44 = vrot.slane %v1165_v41, %v1823_v6  ;;  %s1469_s6 = sshll.u32 %s188_s5, 4 }
  0x21   : > { %435 = vrot.lane.b32.xlu1 %v426_v14, %s1725_s7  ;;  %v1059_v42 = vcombine.high %v1051_v39, %v1051_v39  ;;  %v1058_v43 = vrot.slane %v1044_v40, %v1823_v6  ;;  %v1169_v45 = vcombine.high %v1165_v41, %v1165_v41  ;;  %v332_v57 = vsel %vm231_vm1, %v1840_v12, 0 }
  0x22   : > { %v1184_v46 = vcombine.high %v1176_v44, %v1176_v44  ;;  %v326_v61 = vsel %vm231_vm1, %v1836_v10, 0 }
  0x23   : > { %v1183_v47 = vrot.slane %v1169_v45, %v1823_v6 }
  0x24   : > { %437 = vrot.lane.b32.xlu0 %v434_v17, %s1725_s7 }
  0x25   : > { %439 = vrot.lane.b32.xlu1 %v433_v18, %s1725_s7 }
  0x28   : > { %560 = vrot.lane.b32.xlu0 %v551_v19, %s1726_s8 }
  0x29   : > { %562 = vrot.lane.b32.xlu1 %v559_v22, %s1726_s8 }
  0x2c   : > { %564 = vrot.lane.b32.xlu0 %v558_v23, %s1726_s8 }
  0x2d   : > { %685 = vrot.lane.b32.xlu1 %v676_v24, %s1727_s9 }
  0x30   : > { %687 = vrot.lane.b32.xlu0 %v684_v27, %s1727_s9 }
  0x31   : > { %689 = vrot.lane.b32.xlu1 %v683_v28, %s1727_s9  ;;  %v1486_v28 = vld [vmem:[%s2069_s1 + $0x10] sm:$0xf]  ;;  %s1732_s9 = smov 100  }
  0x34   : > { %810 = vrot.lane.b32.xlu0 %v801_v29, %s1728_s10 }
  0x35   : > { %812 = vrot.lane.b32.xlu1 %v809_v32, %s1728_s10 }
  0x38   : > { %814 = vrot.lane.b32.xlu0 %v808_v33, %s1728_s10 }
  0x39   : > { %935 = vrot.lane.b32.xlu1 %v926_v34, %s1729_s11 }
  0x3c   : > { %937 = vrot.lane.b32.xlu0 %v934_v37, %s1729_s11 }
  0x3d   : > { %939 = vrot.lane.b32.xlu1 %v933_v38, %s1729_s11  ;;  %s1996_s11 = scalar_lea.vmem [#allocation2], %s1469_s6 }
  0x3e   : > { %s1406_s30 = sshll.u32 %s1996_s11, 4  ;;  %s2025_s30 = int_to_ptr.vmem [resolvable:$true] %s1406_s30 }
  0x40   : > { %1060 = vrot.lane.b32.xlu0 %v1051_v39, %s1730_s12 }
  0x41   : > { %1062 = vrot.lane.b32.xlu1 %v1059_v42, %s1730_s12 }
  0x44   : > { %1064 = vrot.lane.b32.xlu0 %v1058_v43, %s1730_s12  ;;  %v1494_v43 = vld [vmem:[%s2069_s1 + $0x18] sm:$0xf]  ;;  %s1733_s12 = smov 114  }
  0x45   : > { %1185 = vrot.lane.b32.xlu1 %v1176_v44, %s1731_s13 }
  0x48   : > { %1187 = vrot.lane.b32.xlu0 %v1184_v46, %s1731_s13 }
  0x49   : > { %1189 = vrot.lane.b32.xlu1 %v1183_v47, %s1731_s13  ;;  %s1734_s13 = smov 124  }
  0x4c   : > { %1293 = vperm.xlu0 %1648, %v1290_v48  }
  0x4d   : > { %1302 = vperm.xlu1 %1649, %v1299_v49  }
  0x8e   : > { %v219_v50 = vpop.permute.xlu0 %218 }
  0x8f   : > { %v223_v51 = vpop.permute.xlu1 %222 }
  0x90   : > { %v239_v52 = vsel %vm231_vm1, %v223_v51, 0 }
  0x91   : > { %1531 = vmatpush3.bf16.msra.mxu1 %v239_v52 }
  0x92   : > { %v221_v53 = vpop.permute.xlu0 %220  ;;  %1536 = vmatprep.subr.bf16.mxu1 %v1721_v3 }
  0x93   : > { %v226_v55 = vsel %vm224_vm2, %v221_v53, %v223_v51  ;;  %v225_v56 = vsel %vm224_vm2, %v219_v50, %v221_v53  ;;  %v436_v59 = vpop.permute.xlu1 %435  ;;  %v1498_v50 = vld [vmem:[%s2069_s1 + $0x1c] sm:$0xf]  ;;  %vm1383_vm2 = vcmask 818176  }
  0x94   : > { %1472 = vmatprep.subr.msk.bf16.mxu0 %vm231_vm1, %v226_v55  ;;  %v233_v58 = vsel %vm231_vm1, %v225_v56, 0  ;;  %1533 = vmatmul.mubr.msk.bf16.vlgmr.msra.gmra.mxu1 %vm227_vm3, %v1471_v54 }
  0x95   : > { %256 = vmatpush1.bf16.msra.mxu0 %v233_v58  ;;  %1537 = vmatpush3.bf16.msra.mxu1 %v332_v57 }
  0x96   : > { %v438_v60 = vpop.permute.xlu0 %437  ;;  %1475 = vmatprep.subr.msk.bf16.mxu0 %vm231_vm1, %v1844_v13  ;;  %1538 = vmatprep.mubr.msk.bf16.mxu1 %vm1722_vm0, %v1721_v3 }
  0x97   : > { %1542 = vmatprep.subr.bf16.mxu1 %v1721_v3  ;;  %v440_v62 = vpop.permute.xlu1 %439  ;;  %v442_v2 = vsel %vm441_vm4, %v436_v59, %v438_v60 }
  0x98   : > { %1473 = vmatmul.mubr.msk.bf16.vlgmr.msra.gmra.mxu0 %vm227_vm3, %v1471_v54  ;;  %v443_v63 = vsel %vm441_vm4, %v438_v60, %v440_v62  ;;  %v454_v4 = vsel %vm231_vm1, %v440_v62, 0  ;;  %v448_v6 = vsel %vm231_vm1, %v442_v2, 0  ;;  %v1502_v54 = vld [vmem:[%s2069_s1 + $0x20] sm:$0xf]  ;;  %vm1352_vm4 = vcmask 1048448  }
  0x99   : > { %349 = vmatpush1.bf16.msra.mxu0 %v326_v61  ;;  %366 = vmatprep.mubr.bf16.mxu0 %v1723_v7 }
  0x9a   : > { %1479 = vmatprep.subr.msk.bf16.mxu0 %vm231_vm1, %v443_v63  ;;  %v561_v1 = vpop.permute.xlu0 %560 }
  0x9b   : > { %v563_v5 = vpop.permute.xlu1 %562 }
  0x9c   : > { %1539 = vmatmul.mubr.msk.bf16.vlgmr.msra.gmra.mxu1 %vm227_vm3, %v198_v0  ;;  %v567_v13 = vsel %vm566_vm5, %v561_v1, %v563_v5 }
  0x9d   : > { %1543 = vmatpush3.bf16.msra.mxu1 %v454_v4  ;;  %1544 = vmatprep.mubr.msk.bf16.mxu1 %vm1722_vm0, %v1721_v3  ;;  %v573_v16 = vsel %vm231_vm1, %v567_v13, 0 }
  0x9e   : > { %v565_v8 = vpop.permute.xlu0 %564  ;;  %1548 = vmatprep.subr.bf16.mxu1 %v1721_v3 }
  0x9f   : > { %v568_v9 = vsel %vm566_vm5, %v563_v5, %v565_v8  ;;  %v686_v10 = vpop.permute.xlu1 %685  ;;  %v579_v14 = vsel %vm231_vm1, %v565_v8, 0 }
  0xa0   : > { %1476 = vmatmul.mubr.msk.bf16.vlgmr.msra.gmra.mxu0 %vm227_vm3, %v198_v0 }
  0xa1   : > { %471 = vmatpush1.bf16.msra.mxu0 %v448_v6  ;;  %488 = vmatprep.mubr.bf16.mxu0 %v1723_v7 }
  0xa2   : > { %1483 = vmatprep.subr.msk.bf16.mxu0 %vm231_vm1, %v568_v9  ;;  %v688_v12 = vpop.permute.xlu0 %687 }
  0xa3   : > { %v690_v15 = vpop.permute.xlu1 %689  ;;  %v692_v21 = vsel %vm691_vm6, %v686_v10, %v688_v12 }
  0xa4   : > { %1545 = vmatmul.mubr.msk.bf16.vlgmr.msra.gmra.mxu1 %vm227_vm3, %v1478_v11  ;;  %v693_v18 = vsel %vm691_vm6, %v688_v12, %v690_v15  ;;  %v704_v22 = vsel %vm231_vm1, %v690_v15, 0  ;;  %v698_v24 = vsel %vm231_vm1, %v692_v21, 0 }
  0xa5   : > { %1549 = vmatpush3.bf16.msra.mxu1 %v579_v14  ;;  %1550 = vmatprep.mubr.msk.bf16.mxu1 %vm1722_vm0, %v1721_v3 }
  0xa6   : > { %v811_v17 = vpop.permute.xlu0 %810  ;;  %1554 = vmatprep.subr.bf16.mxu1 %v1721_v3 }
  0xa7   : > { %v813_v19 = vpop.permute.xlu1 %812 }
  0xa8   : > { %1480 = vmatmul.mubr.msk.bf16.vlgmr.msra.gmra.mxu0 %vm227_vm3, %v1478_v11  ;;  %v817_v29 = vsel %vm816_vm7, %v811_v17, %v813_v19 }
  0xa9   : > { %596 = vmatpush1.bf16.msra.mxu0 %v573_v16  ;;  %613 = vmatprep.mubr.bf16.mxu0 %v1723_v7  ;;  %v823_v32 = vsel %vm231_vm1, %v817_v29, 0 }
  0xaa   : > { %1487 = vmatprep.subr.msk.bf16.mxu0 %vm231_vm1, %v693_v18  ;;  %v815_v23 = vpop.permute.xlu0 %814 }
  0xab   : > { %v936_v25 = vpop.permute.xlu1 %935  ;;  %v818_v26 = vsel %vm816_vm7, %v813_v19, %v815_v23  ;;  %v829_v30 = vsel %vm231_vm1, %v815_v23, 0 }
  0xac   : > { %1551 = vmatmul.mubr.msk.bf16.vlgmr.msra.gmra.mxu1 %vm227_vm3, %v1482_v20 }
  0xad   : > { %1555 = vmatpush3.bf16.msra.mxu1 %v704_v22  ;;  %1556 = vmatprep.mubr.msk.bf16.mxu1 %vm1722_vm0, %v1721_v3 }
  0xae   : > { %1560 = vmatprep.subr.bf16.mxu1 %v1721_v3  ;;  %v938_v27 = vpop.permute.xlu0 %937 }
  0xaf   : > { %v940_v31 = vpop.permute.xlu1 %939  ;;  %v942_v37 = vsel %vm941_vm8, %v936_v25, %v938_v27 }
  0xb0   : > { %1484 = vmatmul.mubr.msk.bf16.vlgmr.msra.gmra.mxu0 %vm227_vm3, %v1482_v20  ;;  %v943_v34 = vsel %vm941_vm8, %v938_v27, %v940_v31  ;;  %v954_v38 = vsel %vm231_vm1, %v940_v31, 0  ;;  %v948_v40 = vsel %vm231_vm1, %v942_v37, 0 }
  0xb1   : > { %721 = vmatpush1.bf16.msra.mxu0 %v698_v24  ;;  %738 = vmatprep.mubr.bf16.mxu0 %v1723_v7 }
  0xb2   : > { %1491 = vmatprep.subr.msk.bf16.mxu0 %vm231_vm1, %v818_v26  ;;  %v1061_v33 = vpop.permute.xlu0 %1060 }
  0xb3   : > { %v1063_v35 = vpop.permute.xlu1 %1062 }
  0xb4   : > { %1557 = vmatmul.mubr.msk.bf16.vlgmr.msra.gmra.mxu1 %vm227_vm3, %v1486_v28  ;;  %v1067_v44 = vsel %vm1066_vm9, %v1061_v33, %v1063_v35 }
  0xb5   : > { %1561 = vmatpush3.bf16.msra.mxu1 %v829_v30  ;;  %1562 = vmatprep.mubr.msk.bf16.mxu1 %vm1722_vm0, %v1721_v3  ;;  %v1073_v48 = vsel %vm231_vm1, %v1067_v44, 0 }
  0xb6   : > { %1566 = vmatprep.subr.bf16.mxu1 %v1721_v3  ;;  %v1065_v39 = vpop.permute.xlu0 %1064 }
  0xb7   : > { %v1186_v41 = vpop.permute.xlu1 %1185  ;;  %v1068_v42 = vsel %vm1066_vm9, %v1063_v35, %v1065_v39  ;;  %v1079_v45 = vsel %vm231_vm1, %v1065_v39, 0 }
  0xb8   : > { %1488 = vmatmul.mubr.msk.bf16.vlgmr.msra.gmra.mxu0 %vm227_vm3, %v1486_v28 }
  0xb9   : > { %846 = vmatpush1.bf16.msra.mxu0 %v823_v32  ;;  %863 = vmatprep.mubr.bf16.mxu0 %v1723_v7 }
  0xba   : > { %1495 = vmatprep.subr.msk.bf16.mxu0 %vm231_vm1, %v943_v34  ;;  %v1188_v46 = vpop.permute.xlu0 %1187 }
  0xbb   : > { %v1190_v47 = vpop.permute.xlu1 %1189  ;;  %v1192_v51 = vsel %vm1191_vm10, %v1186_v41, %v1188_v46 }
  0xbc   : > { %1563 = vmatmul.mubr.msk.bf16.vlgmr.msra.gmra.mxu1 %vm227_vm3, %v1490_v36  ;;  %v1193_v49 = vsel %vm1191_vm10, %v1188_v46, %v1190_v47  ;;  %v1204_v52 = vsel %vm231_vm1, %v1190_v47, 0  ;;  %v1198_v53 = vsel %vm231_vm1, %v1192_v51, 0 }
  0xbd   : > { %1567 = vmatpush3.bf16.msra.mxu1 %v954_v38  ;;  %1568 = vmatprep.mubr.msk.bf16.mxu1 %vm1722_vm0, %v1721_v3 }
  0xbe   : > { %1572 = vmatprep.subr.bf16.mxu1 %v1721_v3 }
  0xc0   : > { %1492 = vmatmul.mubr.msk.bf16.vlgmr.msra.gmra.mxu0 %vm227_vm3, %v1490_v36 }
  0xc1   : > { %971 = vmatpush1.bf16.msra.mxu0 %v948_v40  ;;  %988 = vmatprep.mubr.bf16.mxu0 %v1723_v7 }
  0xc2   : > { %1499 = vmatprep.subr.msk.bf16.mxu0 %vm231_vm1, %v1068_v42 }
  0xc4   : > { %1569 = vmatmul.mubr.msk.bf16.vlgmr.msra.gmra.mxu1 %vm227_vm3, %v1494_v43 }
  0xc5   : > { %1573 = vmatpush3.bf16.msra.mxu1 %v1079_v45  ;;  %1574 = vmatprep.mubr.msk.bf16.mxu1 %vm1722_vm0, %v1721_v3 }
  0xc6   : > { %1578 = vmatprep.subr.bf16.mxu1 %v1721_v3 }
  0xc8   : > { %1496 = vmatmul.mubr.msk.bf16.vlgmr.msra.gmra.mxu0 %vm227_vm3, %v1494_v43 }
  0xc9   : > { %1096 = vmatpush1.bf16.msra.mxu0 %v1073_v48  ;;  %1113 = vmatprep.mubr.bf16.mxu0 %v1723_v7 }
  0xca   : > { %1503 = vmatprep.subr.msk.bf16.mxu0 %vm231_vm1, %v1193_v49  ;;  %vm1342_vm1 = vcmask 917248  }
  0xcc   : > { %1575 = vmatmul.mubr.msk.bf16.vlgmr.msra.gmra.mxu1 %vm227_vm3, %v1498_v50 }
  0xcd   : > { %1579 = vmatpush3.bf16.msra.mxu1 %v1204_v52  ;;  %1580 = vmatprep.mubr.msk.bf16.mxu1 %vm1722_vm0, %v1721_v3  ;;  %vm1337_vm0 = vcmask 786048  }
  0xd0   : > { %1500 = vmatmul.mubr.msk.bf16.vlgmr.msra.gmra.mxu0 %vm227_vm3, %v1498_v50 }
  0xd1   : > { %1221 = vmatpush1.bf16.msra.mxu0 %v1198_v53  ;;  %1238 = vmatprep.mubr.bf16.mxu0 %v1723_v7 }
  0xd4   : > { %1581 = vmatmul.mubr.msk.bf16.vlgmr.msra.gmra.mxu1 %vm227_vm3, %v1502_v54 }
  0xd8   : > { %1504 = vmatmul.mubr.msk.bf16.vlgmr.msra.gmra.mxu0 %vm227_vm3, %v1502_v54  ;;  %vm1349_vm3 = vcmask 932864  }
 0x154   : > { %v316_v55 = vpop.f32.mrf.mxu1 }
 0x156   : > { %v1534_v56 = vpop.f32.mrf.mxu1 }
 0x158   : > { %v275_v57 = vpop.f32.mrf.mxu0  ;;  %v319_v58 = vpop.f32.mrf.mxu1 }
 0x15a   : > { %v277_v59 = vpop.f32.mrf.mxu0  ;;  %v1535_v60 = vpop.f32.mrf.mxu1 }
 0x15c   : > { %v279_v3 = vpop.f32.mrf.mxu0  ;;  %v409_v61 = vpop.f32.mrf.mxu1 }
 0x15d   : > { %v410_v41 = vadd.f32 %v409_v61, %v316_v55 }
 0x15e   : > { %v280_v62 = vpop.f32.mrf.mxu0  ;;  %v1540_v63 = vpop.f32.mrf.mxu1 }
 0x160   : > { %v368_v0 = vpop.f32.mrf.mxu0  ;;  %v412_v7 = vpop.f32.mrf.mxu1 }
 0x161   : > { %v369_v46 = vadd.f32 %v368_v0, %v275_v57 }
 0x162   : > { %v370_v1 = vpop.f32.mrf.mxu0  ;;  %v1541_v2 = vpop.f32.mrf.mxu1 }
 0x163   : > { %v371_v50 = vadd.f32 %v370_v1, %v277_v59 }
 0x164   : > { %v372_v4 = vpop.f32.mrf.mxu0  ;;  %v531_v5 = vpop.f32.mrf.mxu1 }
 0x165   : > { %v539_v44 = vadd.f32 %v531_v5, %v410_v41 }
 0x166   : > { %v373_v6 = vpop.f32.mrf.mxu0  ;;  %v1546_v8 = vpop.f32.mrf.mxu1 }
 0x168   : > { %v490_v9 = vpop.f32.mrf.mxu0  ;;  %v534_v10 = vpop.f32.mrf.mxu1 }
 0x169   : > { %v537_v51 = vadd.f32 %v490_v9, %v369_v46  ;;  %v1294_v9 = vpop.permute.xlu0 %1293 }
 0x16a   : > { %v492_v11 = vpop.f32.mrf.mxu0  ;;  %v1547_v12 = vpop.f32.mrf.mxu1 }
 0x16b   : > { %v538_v56 = vadd.f32 %v492_v11, %v371_v50 }
 0x16c   : > { %v494_v13 = vpop.f32.mrf.mxu0  ;;  %v656_v14 = vpop.f32.mrf.mxu1 }
 0x16d   : > { %v664_v48 = vadd.f32 %v656_v14, %v539_v44 }
 0x16e   : > { %v495_v15 = vpop.f32.mrf.mxu0  ;;  %v1552_v16 = vpop.f32.mrf.mxu1 }
 0x16f   : > { %v1303_v15 = vpop.permute.xlu1 %1302 }
 0x170   : > { %v615_v17 = vpop.f32.mrf.mxu0  ;;  %v659_v18 = vpop.f32.mrf.mxu1 }
 0x171   : > { %v662_v58 = vadd.f32 %v615_v17, %v537_v51 }
 0x172   : > { %v617_v19 = vpop.f32.mrf.mxu0  ;;  %v1553_v20 = vpop.f32.mrf.mxu1 }
 0x173   : > { %v663_v63 = vadd.f32 %v617_v19, %v538_v56 }
 0x174   : > { %v619_v21 = vpop.f32.mrf.mxu0  ;;  %v781_v22 = vpop.f32.mrf.mxu1 }
 0x175   : > { %v789_v53 = vadd.f32 %v781_v22, %v664_v48 }
 0x176   : > { %v620_v23 = vpop.f32.mrf.mxu0  ;;  %v1558_v24 = vpop.f32.mrf.mxu1 }
 0x178   : > { %v740_v25 = vpop.f32.mrf.mxu0  ;;  %v784_v26 = vpop.f32.mrf.mxu1 }
 0x179   : > { %v787_v55 = vadd.f32 %v740_v25, %v662_v58 }
 0x17a   : > { %v742_v27 = vpop.f32.mrf.mxu0  ;;  %v1559_v28 = vpop.f32.mrf.mxu1 }
 0x17b   : > { %v788_v4 = vadd.f32 %v742_v27, %v663_v63 }
 0x17c   : > { %v744_v29 = vpop.f32.mrf.mxu0  ;;  %v906_v30 = vpop.f32.mrf.mxu1 }
 0x17d   : > { %v914_v3 = vadd.f32 %v906_v30, %v789_v53 }
 0x17e   : > { %v745_v31 = vpop.f32.mrf.mxu0  ;;  %v1564_v32 = vpop.f32.mrf.mxu1 }
 0x180   : > { %v865_v33 = vpop.f32.mrf.mxu0  ;;  %v909_v34 = vpop.f32.mrf.mxu1 }
 0x181   : > { %v912_v57 = vadd.f32 %v865_v33, %v787_v55 }
 0x182   : > { %v867_v35 = vpop.f32.mrf.mxu0  ;;  %v1565_v36 = vpop.f32.mrf.mxu1 }
 0x183   : > { %v913_v1 = vadd.f32 %v867_v35, %v788_v4 }
 0x184   : > { %v869_v37 = vpop.f32.mrf.mxu0  ;;  %v1031_v38 = vpop.f32.mrf.mxu1 }
 0x185   : > { %v1039_v7 = vadd.f32 %v1031_v38, %v914_v3 }
 0x186   : > { %v870_v39 = vpop.f32.mrf.mxu0  ;;  %v1570_v40 = vpop.f32.mrf.mxu1 }
 0x188   : > { %v990_v42 = vpop.f32.mrf.mxu0  ;;  %v1034_v43 = vpop.f32.mrf.mxu1 }
 0x189   : > { %v1037_v6 = vadd.f32 %v990_v42, %v912_v57 }
 0x18a   : > { %v992_v45 = vpop.f32.mrf.mxu0  ;;  %v1571_v47 = vpop.f32.mrf.mxu1 }
 0x18b   : > { %v1038_v12 = vadd.f32 %v992_v45, %v913_v1 }
 0x18c   : > { %v994_v49 = vpop.f32.mrf.mxu0  ;;  %v1156_v52 = vpop.f32.mrf.mxu1 }
 0x18d   : > { %v1164_v5 = vadd.f32 %v1156_v52, %v1039_v7 }
 0x18e   : > { %v995_v54 = vpop.f32.mrf.mxu0  ;;  %v1576_v60 = vpop.f32.mrf.mxu1 }
 0x190   : > { %v1115_v62 = vpop.f32.mrf.mxu0  ;;  %v1159_v61 = vpop.f32.mrf.mxu1 }
 0x191   : > { %v1162_v13 = vadd.f32 %v1115_v62, %v1037_v6 }
 0x192   : > { %v1117_v2 = vpop.f32.mrf.mxu0  ;;  %v1577_v0 = vpop.f32.mrf.mxu1 }
 0x193   : > { %v1163_v18 = vadd.f32 %v1117_v2, %v1038_v12 }
 0x194   : > { %v1119_v59 = vpop.f32.mrf.mxu0  ;;  %v1281_v8 = vpop.f32.mrf.mxu1 }
 0x195   : > { %v1289_v10 = vadd.f32 %v1281_v8, %v1164_v5 }
 0x196   : > { %v1120_v11 = vpop.f32.mrf.mxu0  ;;  %v1582_v14 = vpop.f32.mrf.mxu1 }
 0x197   : > { %v1298_v16 = vmul.f32 %v1294_v9, %v1289_v10 }
 0x198   : > { %v1240_v17 = vpop.f32.mrf.mxu0  ;;  %v1284_v20 = vpop.f32.mrf.mxu1 }
 0x199   : > { %v1287_v19 = vadd.f32 %v1240_v17, %v1162_v13  ;;  %v1307_v21 = vadd.f32 %v1303_v15, %v1298_v16 }
 0x19a   : > { %v1242_v22 = vpop.f32.mrf.mxu0  ;;  %v1583_v25 = vpop.f32.mrf.mxu1 }
 0x19b   : > { %v1296_v23 = vmul.f32 %v1294_v9, %v1287_v19  ;;  %v1288_v24 = vadd.f32 %v1242_v22, %v1163_v18  ;;  %v1310_v27 = vmax.f32 %v1307_v21, 0.0 }
 0x19c   : > { %v1244_v26 = vpop.f32.mrf.mxu0 }
 0x19d   : > { %v1305_v28 = vadd.f32 %v1303_v15, %v1296_v23  ;;  %v1297_v29 = vmul.f32 %v1294_v9, %v1288_v24  ;;  %1381 = vrot.lane.b32.xlu1 %v1310_v27, %s1732_s9 }
 0x19e   : > { %v1245_v30 = vpop.f32.mrf.mxu0 }
 0x19f   : > { %v1308_v31 = vmax.f32 %v1305_v28, 0.0  ;;  %v1306_v32 = vadd.f32 %v1303_v15, %v1297_v29 }
 0x1a1   : > { %1314 = vrot.lane.b32.xlu0 %v1308_v31, %s1725_s7  ;;  %1312 = vst.msk [vmem:[%s1996_s11] sm:$0xff] %vm1311_vm11, %v1308_v31  ;;  %1345 = vrot.lane.b32.xlu1 %v1308_v31, %s1733_s12  ;;  %v1309_v33 = vmax.f32 %v1306_v32, 0.0  ;;  %s1738_s7 = smov 118  }
 0x1a5   : > { %1319 = vrot.lane.b32.xlu0 %v1308_v31, %s1734_s13  ;;  %1354 = vrot.lane.b32.xlu1 %v1309_v33, %s1735_s14  ;;  %s1658_s13 = scalar_lea.vmem %s2025_s30, 256  ;;  %s1744_s14 = smov [#allocation2]  }
 0x1a6   : > { %p1659_p11 = scmp.ne.s32.totalorder %s2025_s30, %s1658_s13 }
 0x1a8   : > { %p1660_p12 = pnand %p1659_p11, %p1808_p5 }
 0x1a9   : > { %1324 = vrot.lane.b32.xlu0 %v1308_v31, %s1736_s20  ;;  %1358 = vrot.lane.b32.xlu1 %v1309_v33, %s1726_s8  ;;  %s1743_s8 = smov 98   ;;  %s1662_s20 = sshll.u32 %s1744_s14, 4  ;;  %s1663_s20 = int_to_ptr.vmem [resolvable:$false] %s1662_s20 }
 0x1aa   : > { %p1661_p13 = pneg %p1660_p12  ;;  %p1665_p0 = scmp.lt.s32.totalorder %s2025_s30, %s1663_s20 }
 0x1ad   : > { %1329 = vrot.lane.b32.xlu0 %v1308_v31, %s1737_s22  ;;  %1362 = vrot.lane.b32.xlu1 %v1309_v33, %s1728_s10  ;;  %s1511_s10 = sshll.u32 %s1791_s19, 8  ;;  %s1392_s19 = scalar_lea.sflag [#allocation3], %s188_s5 }
 0x1ae   : > { %s1664_s22 = scalar_lea.vmem %s1663_s20, 512 }
 0x1af   : > { %p1666_p1 = scmp.lt.s32.totalorder %s1664_s22, %s1658_s13 }
 0x1b1   : > { %1334 = vrot.lane.b32.xlu0 %v1308_v31, %s1738_s7  ;;  %1366 = vrot.lane.b32.xlu1 %v1309_v33, %s1739_s23  ;;  %p1667_p2 = por %p1666_p1, %p1665_p0 }
 0x1b3   : > { %p1668_p3 = pnand %p1667_p2, %p1661_p13 }
 0x1b5   : > { %1339 = vrot.lane.b32.xlu0 %v1308_v31, %s1740_s27  ;;  %1370 = vrot.lane.b32.xlu1 %v1309_v33, %s1741_s28 }
 0x1b9   : > { %1379 = vrot.lane.b32.xlu0 %v1309_v33, %s1732_s9  ;;  %1374 = vrot.lane.b32.xlu1 %v1309_v33, %s1742_s29 }
 0x1bd   : > { %1347 = vrot.lane.b32.xlu0 %v1309_v33, %s1733_s12  ;;  %1387 = vrot.lane.b32.xlu1 %v1310_v27, %s1743_s8  ;;  %s2023_s12 = scalar_lea.hbm %s2072_s4, %s1511_s10 }
 0x20f   : > { %v1382_v34 = vpop.permute.xlu1 %1381 }
 0x213   : > { %v1315_v35 = vpop.permute.xlu0 %1314  ;;  %v1346_v36 = vpop.permute.xlu1 %1345 }
 0x214   : > { %1318 = vst.msk [vmem:[%s1996_s11] sm:$0xff] %vm1317_vm12, %v1315_v35 }
 0x217   : > { %v1320_v37 = vpop.permute.xlu0 %1319  ;;  %v1355_v38 = vpop.permute.xlu1 %1354 }
 0x218   : > { %1323 = vst.msk [vmem:[%s1996_s11] sm:$0xff] %vm1322_vm13, %v1320_v37 }
 0x219   : > { %1357 = vst.msk [vmem:[%s1996_s11 + $0x8] sm:$0xff] %vm1311_vm11, %v1355_v38 }
 0x21b   : > { %v1325_v39 = vpop.permute.xlu0 %1324  ;;  %v1359_v40 = vpop.permute.xlu1 %1358 }
 0x21c   : > { %1328 = vst.msk [vmem:[%s1996_s11] sm:$0xff] %vm1327_vm14, %v1325_v39 }
 0x21d   : > { %1361 = vst.msk [vmem:[%s1996_s11 + $0x8] sm:$0xff] %vm1317_vm12, %v1359_v40 }
 0x21f   : > { %v1330_v41 = vpop.permute.xlu0 %1329  ;;  %v1363_v42 = vpop.permute.xlu1 %1362 }
 0x220   : > { %1333 = vst.msk [vmem:[%s1996_s11] sm:$0xff] %vm1332_vm15, %v1330_v41 }
 0x221   : > { %1365 = vst.msk [vmem:[%s1996_s11 + $0x8] sm:$0xff] %vm1322_vm13, %v1363_v42 }
 0x223   : > { %v1335_v43 = vpop.permute.xlu0 %1334  ;;  %v1367_v44 = vpop.permute.xlu1 %1366 }
 0x224   : > { %1338 = vst.msk [vmem:[%s1996_s11] sm:$0xff] %vm1337_vm0, %v1335_v43 }
 0x225   : > { %1369 = vst.msk [vmem:[%s1996_s11 + $0x8] sm:$0xff] %vm1327_vm14, %v1367_v44 }
 0x227   : > { %v1340_v45 = vpop.permute.xlu0 %1339  ;;  %v1371_v46 = vpop.permute.xlu1 %1370 }
 0x228   : > { %1343 = vst.msk [vmem:[%s1996_s11] sm:$0xff] %vm1342_vm1, %v1340_v45 }
 0x229   : > { %1373 = vst.msk [vmem:[%s1996_s11 + $0x8] sm:$0xff] %vm1332_vm15, %v1371_v46 }
 0x22b   : > { %v1380_v47 = vpop.permute.xlu0 %1379  ;;  %v1375_v49 = vpop.permute.xlu1 %1374 }
 0x22c   : > { %v1384_v48 = vsel %vm1383_vm2, %v1380_v47, %v1382_v34  ;;  %1377 = vst.msk [vmem:[%s1996_s11 + $0x8] sm:$0xff] %vm1337_vm0, %v1375_v49 }
 0x22d   : > { %1386 = vst.msk [vmem:[%s1996_s11 + $0x8] sm:$0xff] %vm1342_vm1, %v1384_v48 }
 0x22f   : > { %v1348_v50 = vpop.permute.xlu0 %1347  ;;  %v1388_v52 = vpop.permute.xlu1 %1387 }
 0x230   : > { %v1350_v51 = vsel %vm1349_vm3, %v1346_v36, %v1348_v50  ;;  %1390 = vst.msk [vmem:[%s1996_s11 + $0x8] sm:$0xff] %vm1352_vm4, %v1388_v52 }
 0x231   : > { %1353 = vst.msk [vmem:[%s1996_s11] sm:$0xff] %vm1352_vm4, %v1350_v51 }
 0x232   : > { %1671 = shalt.err (!%p1668_p3)
}
 0x233   : > { %s1672_s11 = scalar_lea.hbm %s2023_s12, 256  ;;  %s1676_s23 = scalar_lea.hbm %s2072_s4, 512 }
 0x234   : > { %p1673_p4 = scmp.ne.s32.totalorder %s2023_s12, %s1672_s11  ;;  %p1677_p9 = scmp.lt.s32.totalorder %s2023_s12, %s2072_s4 }
 0x235   : > { %p1678_p10 = scmp.lt.s32.totalorder %s1676_s23, %s1672_s11 }
 0x236   : > { %p1674_p7 = pnand %p1673_p4, %p1808_p5 }
 0x237   : > { %p1679_p11 = por %p1678_p10, %p1677_p9 }
 0x238   : > { %p1675_p8 = pneg %p1674_p7 }
 0x23a   : > { %p1680_p12 = pnand %p1679_p11, %p1675_p8 }
 0x23c   : > { %1683 = shalt.err (!%p1680_p12)
}
 0x23d   : > { %1585 = dma.vmem_to_hbm [thread:$0]  (%p1808_p5), %s2025_s30, 256, %s2023_s12, %s1392_s19  }
 0x23e PF: > { %p1591_p13 = scmp.ge.s32.totalorder %s1718_s18, 2  ;;  %s1418_s29 = sand.u32 1, %s1706_s15  }
 0x23f   : > { %s1419_s8 = scalar_lea.sflag [#allocation3], %s1418_s29 }
 0x240   : > { %p1588_p0 = pnand %p1591_p13, %p1812_p6 }
 0x242   : > { %p1589_p1 = pneg %p1588_p0 }
 0x244   : > { %1701 = dma.done.wait (%p1589_p1), %s1419_s8, 256  }
 0x245   : > { %1703 = vsyncadd (%p1589_p1), %s1419_s8, 4294967040  ;;  %p14_p2 = scmp.ge.s32.totalorder %s1795_s21, 4   ;;  %s2075_s15 = smov %s1710_s16 }
 0x246   : > { %s2076_s16 = smov %s1714_s17  ;;  %s2077_s17 = smov %s1806_s24 }
 0x247   : > { %s2078_s18 = smov %s1795_s21  ;;  %16 = sbr.rel (!%p14_p2) target bundleno = 3 (0x3), region = 79 }
 0x24c   :  { %1424 = vsyncpa [#allocation3], 1 }
 0x24d   :  { %1426 = vsyncpa [#allocation3 + $0x1], 1 }

</bundles_post_ra>
